<compile_context>
chip_gen: v7x
topology: tpu7x:2x2x1
jax: 0.10.0
libtpu: 0.0.40
codegen_flags: <defaults>
</compile_context>

<pallas_src>
import jax
import jax.numpy as jnp
from jax.experimental import pallas as pl
from jax.experimental.pallas import tpu as pltpu


def _sigmoid(z):
    # 1 / (1 + exp(-z)) with both exp and reciprocal issued on the EUP slot.
    return pl.reciprocal(1.0 + jnp.exp(-z), approx=True)


def mlp_kernel(w1_ref, b1_ref, w2_ref, b2_ref, w3_ref, b3_ref, xT_ref, o_ref):
    """All activations are (features, batch_tile); weights/biases are SMEM scalars.

    w1: (H1, IN)  b1: (H1,)
    w2: (H2, H1)  b2: (H2,)
    w3: (O,  H2)  b3: (O,)
    xT: (IN, TB)  out: (O, TB)
    """
    h1_dim, in_dim = w1_ref.shape
    h2_dim = w2_ref.shape[0]
    out_dim = w3_ref.shape[0]

    # Input rows, kept 2-D (1, TB) so everything stays lane-major.
    x_rows = [xT_ref[k:k + 1, :] for k in range(in_dim)]

    # Layer 1: W1 @ x^T + b1, sigmoid.  Fully unrolled VPU MAC chain.
    h1 = []
    for h in range(h1_dim):
        acc = x_rows[0] * w1_ref[h, 0]
        for k in range(1, in_dim):
            acc = acc + x_rows[k] * w1_ref[h, k]
        h1.append(_sigmoid(acc + b1_ref[h]))

    # Layer 2: W2 @ h1 + b2, sigmoid.
    h2 = []
    for j in range(h2_dim):
        acc = h1[0] * w2_ref[j, 0]
        for k in range(1, h1_dim):
            acc = acc + h1[k] * w2_ref[j, k]
        h2.append(_sigmoid(acc + b2_ref[j]))

    # Layer 3: W3 @ h2 + b3 (no activation), store lane-dense rows.
    for o in range(out_dim):
        acc = h2[0] * w3_ref[o, 0]
        for k in range(1, h2_dim):
            acc = acc + h2[k] * w3_ref[o, k]
        o_ref[o:o + 1, :] = (acc + b3_ref[o]).astype(o_ref.dtype)


def l2_sigmoid_lr(x, params, *, block_b=1024):
    """Fused forward of L2SigmoidLR.

    x: (batch, in_features) float32
    params: PyTorch-convention weights:
        w1: (hidden, in), b1: (hidden,)
        w2: (hidden, hidden), b2: (hidden,)
        w3: (out, hidden), b3: (out,)
    """
    batch, in_features = x.shape
    w1, b1 = params["w1"], params["b1"]
    w2, b2 = params["w2"], params["b2"]
    w3, b3 = params["w3"], params["b3"]
    out_features = w3.shape[0]

    # Batch-on-lanes: pad batch up to a multiple of the lane width, choose a
    # lane-dense tile (<= block_b), and make the padded batch a tile multiple.
    lane = 128
    padded = max(lane, ((batch + lane - 1) // lane) * lane)
    tb = min(block_b, padded)
    padded = ((padded + tb - 1) // tb) * tb

    xT = jnp.pad(x.T, ((0, 0), (0, padded - batch)))

    smem = pl.BlockSpec(memory_space=pltpu.MemorySpace.SMEM)

    outT = pl.pallas_call(
        mlp_kernel,
        out_shape=jax.ShapeDtypeStruct((out_features, padded), x.dtype),
        grid=(padded // tb,),
        in_specs=[smem, smem, smem, smem, smem, smem,
                  pl.BlockSpec((in_features, tb), lambda i: (0, i))],
        out_specs=pl.BlockSpec((out_features, tb), lambda i: (0, i)),
        compiler_params=pltpu.CompilerParams(
            dimension_semantics=("parallel",),
            vmem_limit_bytes=32 << 20,  # tiles are KB-scale; safe on v7x's 64 MiB
        ),
    )(w1, b1, w2, b2, w3, b3, xT)

    # Back to (batch, out_features); drop padded columns.
    return outT[:, :batch].T


def init_params(key, in_features=2, hidden_dim=4, out_features=1):
    """Deterministic init mimicking nn.Linear's U(-1/sqrt(fan_in), 1/sqrt(fan_in))."""
    ks = jax.random.split(key, 6)

    def lin(kw, kb, fan_in, fan_out):
        bound = 1.0 / jnp.sqrt(jnp.float32(fan_in))
        w = jax.random.uniform(kw, (fan_out, fan_in), jnp.float32, -bound, bound)
        b = jax.random.uniform(kb, (fan_out,), jnp.float32, -bound, bound)
        return w, b

    w1, b1 = lin(ks[0], ks[1], in_features, hidden_dim)
    w2, b2 = lin(ks[2], ks[3], hidden_dim, hidden_dim)
    w3, b3 = lin(ks[4], ks[5], hidden_dim, out_features)
    return {"w1": w1, "b1": b1, "w2": w2, "b2": b2, "w3": w3, "b3": b3}


def reference_forward(x, p):
    """Pure-JAX reference matching the PyTorch module semantics."""
    h = jax.nn.sigmoid(x @ p["w1"].T + p["b1"])
    h = jax.nn.sigmoid(h @ p["w2"].T + p["b2"])
    return h @ p["w3"].T + p["b3"]


if __name__ == "__main__":
    key = jax.random.PRNGKey(0)
    k_x, k_p = jax.random.split(key)

    in_features, hidden_dim, out_features = 2, 4, 1
    batch = 8

    x = jax.random.normal(k_x, (batch, in_features), jnp.float32)
    params = init_params(k_p, in_features, hidden_dim, out_features)

    out = l2_sigmoid_lr(x, params)
    out = jax.block_until_ready(out)

    ref = reference_forward(x, params)
    assert out.shape == (batch, out_features), out.shape
    # Tolerance slightly relaxed vs exact: sigmoid uses the EUP approximate
    # reciprocal (rel. err ~6e-5), which propagates through two layers.
    assert jnp.allclose(out, ref, atol=2e-3, rtol=1e-3), (out, ref)

    print("KERNEL_OK")
</pallas_src>

<mosaic_0001>
module attributes {stable_mosaic.version = 11 : i64} {
  func.func @mlp_kernel(%arg0: i32, %arg1: memref<4x2xf32, #tpu.memory_space<smem>>, %arg2: memref<4xf32, #tpu.memory_space<smem>>, %arg3: memref<4x4xf32, #tpu.memory_space<smem>>, %arg4: memref<4xf32, #tpu.memory_space<smem>>, %arg5: memref<1x4xf32, #tpu.memory_space<smem>>, %arg6: memref<1xf32, #tpu.memory_space<smem>>, %arg7: memref<2x128xf32, #tpu.memory_space<vmem>>, %arg8: memref<1x128xf32, #tpu.memory_space<vmem>>) attributes {dimension_semantics = [#tpu.dimension_semantics<parallel>], iteration_bounds = array<i64: 1>, scalar_prefetch = 0 : i64, scratch_operands = 0 : i64, tpu.core_type = #tpu.core_type<tc>, window_params = [{transform_indices = @transform_0, window_bounds = array<i64: 4, 2>}, {transform_indices = @transform_1, window_bounds = array<i64: 4>}, {transform_indices = @transform_2, window_bounds = array<i64: 4, 4>}, {transform_indices = @transform_3, window_bounds = array<i64: 4>}, {transform_indices = @transform_4, window_bounds = array<i64: 1, 4>}, {transform_indices = @transform_5, window_bounds = array<i64: 1>}, {transform_indices = @transform_6, window_bounds = array<i64: 2, 128>}, {transform_indices = @transform_7, window_bounds = array<i64: 1, 128>}]} {
    %c0 = arith.constant 0 : index
    %c0_0 = arith.constant 0 : index
    %0 = vector.load %arg7[%c0, %c0_0] : memref<2x128xf32, #tpu.memory_space<vmem>>, vector<1x128xf32>
    %c1 = arith.constant 1 : index
    %c0_1 = arith.constant 0 : index
    %1 = vector.load %arg7[%c1, %c0_1] : memref<2x128xf32, #tpu.memory_space<vmem>>, vector<1x128xf32>
    %c0_2 = arith.constant 0 : index
    %c0_3 = arith.constant 0 : index
    %2 = memref.load %arg1[%c0_2, %c0_3] : memref<4x2xf32, #tpu.memory_space<smem>>
    %3 = vector.broadcast %2 : f32 to vector<1x128xf32>
    %4 = arith.mulf %0, %3 : vector<1x128xf32>
    %c0_4 = arith.constant 0 : index
    %c1_5 = arith.constant 1 : index
    %5 = memref.load %arg1[%c0_4, %c1_5] : memref<4x2xf32, #tpu.memory_space<smem>>
    %6 = vector.broadcast %5 : f32 to vector<1x128xf32>
    %7 = arith.mulf %1, %6 : vector<1x128xf32>
    %8 = arith.addf %4, %7 : vector<1x128xf32>
    %c0_6 = arith.constant 0 : index
    %9 = memref.load %arg2[%c0_6] : memref<4xf32, #tpu.memory_space<smem>>
    %10 = vector.broadcast %9 : f32 to vector<1x128xf32>
    %11 = arith.addf %8, %10 : vector<1x128xf32>
    %cst = arith.constant 0.000000e+00 : f32
    %12 = vector.broadcast %cst : f32 to vector<1x128xf32>
    %13 = arith.subf %12, %11 : vector<1x128xf32>
    %14 = math.exp %13 : vector<1x128xf32>
    %cst_7 = arith.constant 1.000000e+00 : f32
    %15 = vector.broadcast %cst_7 : f32 to vector<1x128xf32>
    %16 = arith.addf %15, %14 : vector<1x128xf32>
    %17 = tpu.reciprocal %16 {approx = true} : vector<1x128xf32> -> vector<1x128xf32>
    %c1_8 = arith.constant 1 : index
    %c0_9 = arith.constant 0 : index
    %18 = memref.load %arg1[%c1_8, %c0_9] : memref<4x2xf32, #tpu.memory_space<smem>>
    %19 = vector.broadcast %18 : f32 to vector<1x128xf32>
    %20 = arith.mulf %0, %19 : vector<1x128xf32>
    %c1_10 = arith.constant 1 : index
    %c1_11 = arith.constant 1 : index
    %21 = memref.load %arg1[%c1_10, %c1_11] : memref<4x2xf32, #tpu.memory_space<smem>>
    %22 = vector.broadcast %21 : f32 to vector<1x128xf32>
    %23 = arith.mulf %1, %22 : vector<1x128xf32>
    %24 = arith.addf %20, %23 : vector<1x128xf32>
    %c1_12 = arith.constant 1 : index
    %25 = memref.load %arg2[%c1_12] : memref<4xf32, #tpu.memory_space<smem>>
    %26 = vector.broadcast %25 : f32 to vector<1x128xf32>
    %27 = arith.addf %24, %26 : vector<1x128xf32>
    %cst_13 = arith.constant 0.000000e+00 : f32
    %28 = vector.broadcast %cst_13 : f32 to vector<1x128xf32>
    %29 = arith.subf %28, %27 : vector<1x128xf32>
    %30 = math.exp %29 : vector<1x128xf32>
    %cst_14 = arith.constant 1.000000e+00 : f32
    %31 = vector.broadcast %cst_14 : f32 to vector<1x128xf32>
    %32 = arith.addf %31, %30 : vector<1x128xf32>
    %33 = tpu.reciprocal %32 {approx = true} : vector<1x128xf32> -> vector<1x128xf32>
    %c2 = arith.constant 2 : index
    %c0_15 = arith.constant 0 : index
    %34 = memref.load %arg1[%c2, %c0_15] : memref<4x2xf32, #tpu.memory_space<smem>>
    %35 = vector.broadcast %34 : f32 to vector<1x128xf32>
    %36 = arith.mulf %0, %35 : vector<1x128xf32>
    %c2_16 = arith.constant 2 : index
    %c1_17 = arith.constant 1 : index
    %37 = memref.load %arg1[%c2_16, %c1_17] : memref<4x2xf32, #tpu.memory_space<smem>>
    %38 = vector.broadcast %37 : f32 to vector<1x128xf32>
    %39 = arith.mulf %1, %38 : vector<1x128xf32>
    %40 = arith.addf %36, %39 : vector<1x128xf32>
    %c2_18 = arith.constant 2 : index
    %41 = memref.load %arg2[%c2_18] : memref<4xf32, #tpu.memory_space<smem>>
    %42 = vector.broadcast %41 : f32 to vector<1x128xf32>
    %43 = arith.addf %40, %42 : vector<1x128xf32>
    %cst_19 = arith.constant 0.000000e+00 : f32
    %44 = vector.broadcast %cst_19 : f32 to vector<1x128xf32>
    %45 = arith.subf %44, %43 : vector<1x128xf32>
    %46 = math.exp %45 : vector<1x128xf32>
    %cst_20 = arith.constant 1.000000e+00 : f32
    %47 = vector.broadcast %cst_20 : f32 to vector<1x128xf32>
    %48 = arith.addf %47, %46 : vector<1x128xf32>
    %49 = tpu.reciprocal %48 {approx = true} : vector<1x128xf32> -> vector<1x128xf32>
    %c3 = arith.constant 3 : index
    %c0_21 = arith.constant 0 : index
    %50 = memref.load %arg1[%c3, %c0_21] : memref<4x2xf32, #tpu.memory_space<smem>>
    %51 = vector.broadcast %50 : f32 to vector<1x128xf32>
    %52 = arith.mulf %0, %51 : vector<1x128xf32>
    %c3_22 = arith.constant 3 : index
    %c1_23 = arith.constant 1 : index
    %53 = memref.load %arg1[%c3_22, %c1_23] : memref<4x2xf32, #tpu.memory_space<smem>>
    %54 = vector.broadcast %53 : f32 to vector<1x128xf32>
    %55 = arith.mulf %1, %54 : vector<1x128xf32>
    %56 = arith.addf %52, %55 : vector<1x128xf32>
    %c3_24 = arith.constant 3 : index
    %57 = memref.load %arg2[%c3_24] : memref<4xf32, #tpu.memory_space<smem>>
    %58 = vector.broadcast %57 : f32 to vector<1x128xf32>
    %59 = arith.addf %56, %58 : vector<1x128xf32>
    %cst_25 = arith.constant 0.000000e+00 : f32
    %60 = vector.broadcast %cst_25 : f32 to vector<1x128xf32>
    %61 = arith.subf %60, %59 : vector<1x128xf32>
    %62 = math.exp %61 : vector<1x128xf32>
    %cst_26 = arith.constant 1.000000e+00 : f32
    %63 = vector.broadcast %cst_26 : f32 to vector<1x128xf32>
    %64 = arith.addf %63, %62 : vector<1x128xf32>
    %65 = tpu.reciprocal %64 {approx = true} : vector<1x128xf32> -> vector<1x128xf32>
    %c0_27 = arith.constant 0 : index
    %c0_28 = arith.constant 0 : index
    %66 = memref.load %arg3[%c0_27, %c0_28] : memref<4x4xf32, #tpu.memory_space<smem>>
    %67 = vector.broadcast %66 : f32 to vector<1x128xf32>
    %68 = arith.mulf %17, %67 : vector<1x128xf32>
    %c0_29 = arith.constant 0 : index
    %c1_30 = arith.constant 1 : index
    %69 = memref.load %arg3[%c0_29, %c1_30] : memref<4x4xf32, #tpu.memory_space<smem>>
    %70 = vector.broadcast %69 : f32 to vector<1x128xf32>
    %71 = arith.mulf %33, %70 : vector<1x128xf32>
    %72 = arith.addf %68, %71 : vector<1x128xf32>
    %c0_31 = arith.constant 0 : index
    %c2_32 = arith.constant 2 : index
    %73 = memref.load %arg3[%c0_31, %c2_32] : memref<4x4xf32, #tpu.memory_space<smem>>
    %74 = vector.broadcast %73 : f32 to vector<1x128xf32>
    %75 = arith.mulf %49, %74 : vector<1x128xf32>
    %76 = arith.addf %72, %75 : vector<1x128xf32>
    %c0_33 = arith.constant 0 : index
    %c3_34 = arith.constant 3 : index
    %77 = memref.load %arg3[%c0_33, %c3_34] : memref<4x4xf32, #tpu.memory_space<smem>>
    %78 = vector.broadcast %77 : f32 to vector<1x128xf32>
    %79 = arith.mulf %65, %78 : vector<1x128xf32>
    %80 = arith.addf %76, %79 : vector<1x128xf32>
    %c0_35 = arith.constant 0 : index
    %81 = memref.load %arg4[%c0_35] : memref<4xf32, #tpu.memory_space<smem>>
    %82 = vector.broadcast %81 : f32 to vector<1x128xf32>
    %83 = arith.addf %80, %82 : vector<1x128xf32>
    %cst_36 = arith.constant 0.000000e+00 : f32
    %84 = vector.broadcast %cst_36 : f32 to vector<1x128xf32>
    %85 = arith.subf %84, %83 : vector<1x128xf32>
    %86 = math.exp %85 : vector<1x128xf32>
    %cst_37 = arith.constant 1.000000e+00 : f32
    %87 = vector.broadcast %cst_37 : f32 to vector<1x128xf32>
    %88 = arith.addf %87, %86 : vector<1x128xf32>
    %89 = tpu.reciprocal %88 {approx = true} : vector<1x128xf32> -> vector<1x128xf32>
    %c1_38 = arith.constant 1 : index
    %c0_39 = arith.constant 0 : index
    %90 = memref.load %arg3[%c1_38, %c0_39] : memref<4x4xf32, #tpu.memory_space<smem>>
    %91 = vector.broadcast %90 : f32 to vector<1x128xf32>
    %92 = arith.mulf %17, %91 : vector<1x128xf32>
    %c1_40 = arith.constant 1 : index
    %c1_41 = arith.constant 1 : index
    %93 = memref.load %arg3[%c1_40, %c1_41] : memref<4x4xf32, #tpu.memory_space<smem>>
    %94 = vector.broadcast %93 : f32 to vector<1x128xf32>
    %95 = arith.mulf %33, %94 : vector<1x128xf32>
    %96 = arith.addf %92, %95 : vector<1x128xf32>
    %c1_42 = arith.constant 1 : index
    %c2_43 = arith.constant 2 : index
    %97 = memref.load %arg3[%c1_42, %c2_43] : memref<4x4xf32, #tpu.memory_space<smem>>
    %98 = vector.broadcast %97 : f32 to vector<1x128xf32>
    %99 = arith.mulf %49, %98 : vector<1x128xf32>
    %100 = arith.addf %96, %99 : vector<1x128xf32>
    %c1_44 = arith.constant 1 : index
    %c3_45 = arith.constant 3 : index
    %101 = memref.load %arg3[%c1_44, %c3_45] : memref<4x4xf32, #tpu.memory_space<smem>>
    %102 = vector.broadcast %101 : f32 to vector<1x128xf32>
    %103 = arith.mulf %65, %102 : vector<1x128xf32>
    %104 = arith.addf %100, %103 : vector<1x128xf32>
    %c1_46 = arith.constant 1 : index
    %105 = memref.load %arg4[%c1_46] : memref<4xf32, #tpu.memory_space<smem>>
    %106 = vector.broadcast %105 : f32 to vector<1x128xf32>
    %107 = arith.addf %104, %106 : vector<1x128xf32>
    %cst_47 = arith.constant 0.000000e+00 : f32
    %108 = vector.broadcast %cst_47 : f32 to vector<1x128xf32>
    %109 = arith.subf %108, %107 : vector<1x128xf32>
    %110 = math.exp %109 : vector<1x128xf32>
    %cst_48 = arith.constant 1.000000e+00 : f32
    %111 = vector.broadcast %cst_48 : f32 to vector<1x128xf32>
    %112 = arith.addf %111, %110 : vector<1x128xf32>
    %113 = tpu.reciprocal %112 {approx = true} : vector<1x128xf32> -> vector<1x128xf32>
    %c2_49 = arith.constant 2 : index
    %c0_50 = arith.constant 0 : index
    %114 = memref.load %arg3[%c2_49, %c0_50] : memref<4x4xf32, #tpu.memory_space<smem>>
    %115 = vector.broadcast %114 : f32 to vector<1x128xf32>
    %116 = arith.mulf %17, %115 : vector<1x128xf32>
    %c2_51 = arith.constant 2 : index
    %c1_52 = arith.constant 1 : index
    %117 = memref.load %arg3[%c2_51, %c1_52] : memref<4x4xf32, #tpu.memory_space<smem>>
    %118 = vector.broadcast %117 : f32 to vector<1x128xf32>
    %119 = arith.mulf %33, %118 : vector<1x128xf32>
    %120 = arith.addf %116, %119 : vector<1x128xf32>
    %c2_53 = arith.constant 2 : index
    %c2_54 = arith.constant 2 : index
    %121 = memref.load %arg3[%c2_53, %c2_54] : memref<4x4xf32, #tpu.memory_space<smem>>
    %122 = vector.broadcast %121 : f32 to vector<1x128xf32>
    %123 = arith.mulf %49, %122 : vector<1x128xf32>
    %124 = arith.addf %120, %123 : vector<1x128xf32>
    %c2_55 = arith.constant 2 : index
    %c3_56 = arith.constant 3 : index
    %125 = memref.load %arg3[%c2_55, %c3_56] : memref<4x4xf32, #tpu.memory_space<smem>>
    %126 = vector.broadcast %125 : f32 to vector<1x128xf32>
    %127 = arith.mulf %65, %126 : vector<1x128xf32>
    %128 = arith.addf %124, %127 : vector<1x128xf32>
    %c2_57 = arith.constant 2 : index
    %129 = memref.load %arg4[%c2_57] : memref<4xf32, #tpu.memory_space<smem>>
    %130 = vector.broadcast %129 : f32 to vector<1x128xf32>
    %131 = arith.addf %128, %130 : vector<1x128xf32>
    %cst_58 = arith.constant 0.000000e+00 : f32
    %132 = vector.broadcast %cst_58 : f32 to vector<1x128xf32>
    %133 = arith.subf %132, %131 : vector<1x128xf32>
    %134 = math.exp %133 : vector<1x128xf32>
    %cst_59 = arith.constant 1.000000e+00 : f32
    %135 = vector.broadcast %cst_59 : f32 to vector<1x128xf32>
    %136 = arith.addf %135, %134 : vector<1x128xf32>
    %137 = tpu.reciprocal %136 {approx = true} : vector<1x128xf32> -> vector<1x128xf32>
    %c3_60 = arith.constant 3 : index
    %c0_61 = arith.constant 0 : index
    %138 = memref.load %arg3[%c3_60, %c0_61] : memref<4x4xf32, #tpu.memory_space<smem>>
    %139 = vector.broadcast %138 : f32 to vector<1x128xf32>
    %140 = arith.mulf %17, %139 : vector<1x128xf32>
    %c3_62 = arith.constant 3 : index
    %c1_63 = arith.constant 1 : index
    %141 = memref.load %arg3[%c3_62, %c1_63] : memref<4x4xf32, #tpu.memory_space<smem>>
    %142 = vector.broadcast %141 : f32 to vector<1x128xf32>
    %143 = arith.mulf %33, %142 : vector<1x128xf32>
    %144 = arith.addf %140, %143 : vector<1x128xf32>
    %c3_64 = arith.constant 3 : index
    %c2_65 = arith.constant 2 : index
    %145 = memref.load %arg3[%c3_64, %c2_65] : memref<4x4xf32, #tpu.memory_space<smem>>
    %146 = vector.broadcast %145 : f32 to vector<1x128xf32>
    %147 = arith.mulf %49, %146 : vector<1x128xf32>
    %148 = arith.addf %144, %147 : vector<1x128xf32>
    %c3_66 = arith.constant 3 : index
    %c3_67 = arith.constant 3 : index
    %149 = memref.load %arg3[%c3_66, %c3_67] : memref<4x4xf32, #tpu.memory_space<smem>>
    %150 = vector.broadcast %149 : f32 to vector<1x128xf32>
    %151 = arith.mulf %65, %150 : vector<1x128xf32>
    %152 = arith.addf %148, %151 : vector<1x128xf32>
    %c3_68 = arith.constant 3 : index
    %153 = memref.load %arg4[%c3_68] : memref<4xf32, #tpu.memory_space<smem>>
    %154 = vector.broadcast %153 : f32 to vector<1x128xf32>
    %155 = arith.addf %152, %154 : vector<1x128xf32>
    %cst_69 = arith.constant 0.000000e+00 : f32
    %156 = vector.broadcast %cst_69 : f32 to vector<1x128xf32>
    %157 = arith.subf %156, %155 : vector<1x128xf32>
    %158 = math.exp %157 : vector<1x128xf32>
    %cst_70 = arith.constant 1.000000e+00 : f32
    %159 = vector.broadcast %cst_70 : f32 to vector<1x128xf32>
    %160 = arith.addf %159, %158 : vector<1x128xf32>
    %161 = tpu.reciprocal %160 {approx = true} : vector<1x128xf32> -> vector<1x128xf32>
    %c0_71 = arith.constant 0 : index
    %c0_72 = arith.constant 0 : index
    %162 = memref.load %arg5[%c0_71, %c0_72] : memref<1x4xf32, #tpu.memory_space<smem>>
    %163 = vector.broadcast %162 : f32 to vector<1x128xf32>
    %164 = arith.mulf %89, %163 : vector<1x128xf32>
    %c0_73 = arith.constant 0 : index
    %c1_74 = arith.constant 1 : index
    %165 = memref.load %arg5[%c0_73, %c1_74] : memref<1x4xf32, #tpu.memory_space<smem>>
    %166 = vector.broadcast %165 : f32 to vector<1x128xf32>
    %167 = arith.mulf %113, %166 : vector<1x128xf32>
    %168 = arith.addf %164, %167 : vector<1x128xf32>
    %c0_75 = arith.constant 0 : index
    %c2_76 = arith.constant 2 : index
    %169 = memref.load %arg5[%c0_75, %c2_76] : memref<1x4xf32, #tpu.memory_space<smem>>
    %170 = vector.broadcast %169 : f32 to vector<1x128xf32>
    %171 = arith.mulf %137, %170 : vector<1x128xf32>
    %172 = arith.addf %168, %171 : vector<1x128xf32>
    %c0_77 = arith.constant 0 : index
    %c3_78 = arith.constant 3 : index
    %173 = memref.load %arg5[%c0_77, %c3_78] : memref<1x4xf32, #tpu.memory_space<smem>>
    %174 = vector.broadcast %173 : f32 to vector<1x128xf32>
    %175 = arith.mulf %161, %174 : vector<1x128xf32>
    %176 = arith.addf %172, %175 : vector<1x128xf32>
    %c0_79 = arith.constant 0 : index
    %177 = memref.load %arg6[%c0_79] : memref<1xf32, #tpu.memory_space<smem>>
    %178 = vector.broadcast %177 : f32 to vector<1x128xf32>
    %179 = arith.addf %176, %178 : vector<1x128xf32>
    %c0_80 = arith.constant 0 : index
    %c0_81 = arith.constant 0 : index
    %180 = vector.load %arg8[%c0_80, %c0_81] : memref<1x128xf32, #tpu.memory_space<vmem>>, vector<1x128xf32>
    tpu.vector_store %arg8[%c0_80, %c0_81], %179 {strides = array<i32>} : memref<1x128xf32, #tpu.memory_space<vmem>>, vector<1x128xf32>,
    return
  }
  func.func @transform_0(%arg0: i32) -> (i32, i32) {
    %c0_i32 = arith.constant 0 : i32
    %c0_i32_0 = arith.constant 0 : i32
    %c0_i32_1 = arith.constant 0 : i32
    return %c0_i32, %c0_i32_0 : i32, i32
  }
  func.func @transform_1(%arg0: i32) -> i32 {
    %c0_i32 = arith.constant 0 : i32
    %c0_i32_0 = arith.constant 0 : i32
    return %c0_i32 : i32
  }
  func.func @transform_2(%arg0: i32) -> (i32, i32) {
    %c0_i32 = arith.constant 0 : i32
    %c0_i32_0 = arith.constant 0 : i32
    %c0_i32_1 = arith.constant 0 : i32
    return %c0_i32, %c0_i32_0 : i32, i32
  }
  func.func @transform_3(%arg0: i32) -> i32 {
    %c0_i32 = arith.constant 0 : i32
    %c0_i32_0 = arith.constant 0 : i32
    return %c0_i32 : i32
  }
  func.func @transform_4(%arg0: i32) -> (i32, i32) {
    %c0_i32 = arith.constant 0 : i32
    %c0_i32_0 = arith.constant 0 : i32
    %c0_i32_1 = arith.constant 0 : i32
    return %c0_i32, %c0_i32_0 : i32, i32
  }
  func.func @transform_5(%arg0: i32) -> i32 {
    %c0_i32 = arith.constant 0 : i32
    %c0_i32_0 = arith.constant 0 : i32
    return %c0_i32 : i32
  }
  func.func @transform_6(%arg0: i32) -> (i32, i32) {
    %c0_i32 = arith.constant 0 : i32
    %c0_i32_0 = arith.constant 0 : i32
    return %c0_i32, %arg0 : i32, i32
  }
  func.func @transform_7(%arg0: i32) -> (i32, i32) {
    %c0_i32 = arith.constant 0 : i32
    %c0_i32_0 = arith.constant 0 : i32
    return %c0_i32, %arg0 : i32, i32
  }
}

</mosaic_0001>

<bundles_post_ra>
// kernel: tpu_custom_call.1
= control target key start
LH: loop header
LB: loop body
LE: loop exit
PB: predicated region body
PF: predicated region fallthrough
CT: control target
= control target key end

     0   :  { %13 = vsyncpa [#allocation5], 0  ;;  %s587_s0 = inlined_call_operand.vmem [shape: f32[4,2], index: 0, kind: input, shape index: {}]   ;;  %s588_s1 = inlined_call_operand.vmem [shape: f32[4], index: 1, kind: input, shape index: {}]   ;;  %s589_s2 = inlined_call_operand.vmem [shape: f32[4,4], index: 2, kind: input, shape index: {}]   ;;  %s590_s3 = inlined_call_operand.vmem [shape: f32[4], index: 3, kind: input, shape index: {}]   ;;  %s591_s4 = inlined_call_operand.vmem [shape: f32[1,4], index: 4, kind: input, shape index: {}]   ;;  %s592_s5 = inlined_call_operand.<no memory space> [shape: f32[1], index: 5, kind: input, shape index: {}]   ;;  %s593_s6 = inlined_call_operand.vmem [shape: f32[2,128], index: 6, kind: input, shape index: {}]   ;;  %s594_s7 = inlined_call_operand.hbm [shape: f32[1,128], index: 7, kind: output, shape index: {}]  }
   0x1   :  { %14 = vsyncpa [#allocation7], 0 }
   0x2   :  { %15 = vsyncpa [#allocation10], 0  ;;  %s33_s26 = sshll.u32 %s588_s1, 4  ;;  %s34_s26 = int_to_ptr.vmem [resolvable:$true] %s33_s26 }
   0x3   :  { %16 = vsyncpa [#allocation4], 0  ;;  %s53_s29 = sshll.u32 %s590_s3, 4  ;;  %s346_s30 = scalar_lea.vmem %s34_s26, 16  ;;  %s54_s29 = int_to_ptr.vmem [resolvable:$true] %s53_s29 }
   0x4   :  { %p347_p0 = scmp.ne.s32.totalorder %s34_s26, %s346_s30  ;;  %p351_p1 = scmp.lt.s32.totalorder %s34_s26, %s34_s26 }
   0x5   :  { %p352_p2 = scmp.lt.s32.totalorder %s346_s30, %s346_s30 }
   0x7   :  { %p353_p3 = por %p352_p2, %p351_p1 }
   0x9   :  { %p354_p4 = pnand %p353_p3, %p347_p0 }
   0xb   :  { %357 = shalt.err (!%p354_p4)
}
   0xc   :  { %s436_s8 = smov [#allocation6]   ;;  %s358_s9 = scalar_lea.vmem %s54_s29, 16 }
   0xd   :  { %36 = dma.vmem_to_smem %s34_s26, 16, %s436_s8, [#allocation7]  }
   0xe   :  { %p359_p5 = scmp.ne.s32.totalorder %s54_s29, %s358_s9  ;;  %p363_p6 = scmp.lt.s32.totalorder %s54_s29, %s54_s29 }
   0xf   :  { %p364_p7 = scmp.lt.s32.totalorder %s358_s9, %s358_s9 }
  0x11   :  { %p365_p8 = por %p364_p7, %p363_p6 }
  0x13   :  { %p366_p9 = pnand %p365_p8, %p359_p5 }
  0x15   :  { %369 = shalt.err (!%p366_p9)
}
  0x16   :  { %s437_s1 = smov [#allocation9]   ;;  %s23_s11 = sshll.u32 %s587_s0, 4  ;;  %s24_s11 = int_to_ptr.vmem [resolvable:$true] %s23_s11 }
  0x17   :  { %56 = dma.vmem_to_smem %s54_s29, 16, %s437_s1, [#allocation10]  }
  0x18   :  { %s43_s14 = sshll.u32 %s589_s2, 4  ;;  %s370_s15 = scalar_lea.vmem %s24_s11, 64  ;;  %s44_s14 = int_to_ptr.vmem [resolvable:$true] %s43_s14 }
  0x19   :  { %p371_p10 = scmp.ne.s32.totalorder %s24_s11, %s370_s15  ;;  %p375_p11 = scmp.lt.s32.totalorder %s24_s11, %s24_s11 }
  0x1a   :  { %p376_p12 = scmp.lt.s32.totalorder %s370_s15, %s370_s15 }
  0x1c   :  { %p377_p13 = por %p376_p12, %p375_p11 }
  0x1e   :  { %p378_p0 = pnand %p377_p13, %p371_p10 }
  0x20   :  { %381 = shalt.err (!%p378_p0)
}
  0x21   :  { %s438_s16 = smov [#allocation3]   ;;  %s382_s17 = scalar_lea.vmem %s44_s14, 64 }
  0x22   :  { %26 = dma.vmem_to_smem %s24_s11, 64, %s438_s16, [#allocation5]  }
  0x23   :  { %p383_p1 = scmp.ne.s32.totalorder %s44_s14, %s382_s17  ;;  %p387_p2 = scmp.lt.s32.totalorder %s44_s14, %s44_s14 }
  0x24   :  { %p388_p3 = scmp.lt.s32.totalorder %s382_s17, %s382_s17 }
  0x26   :  { %p389_p4 = por %p388_p3, %p387_p2 }
  0x28   :  { %p390_p5 = pnand %p389_p4, %p383_p1 }
  0x2a   :  { %393 = shalt.err (!%p390_p5)
}
  0x2b   :  { %s439_s0 = smov [#allocation8]   ;;  %s63_s19 = sshll.u32 %s591_s4, 4  ;;  %s64_s19 = int_to_ptr.vmem [resolvable:$true] %s63_s19 }
  0x2c   :  { %46 = dma.vmem_to_smem %s44_s14, 64, %s439_s0, [#allocation7]  }
  0x2d   :  { %s394_s20 = scalar_lea.vmem %s64_s19, 16  ;;  %p399_p7 = scmp.lt.s32.totalorder %s64_s19, %s64_s19 }
  0x2e   :  { %p395_p6 = scmp.ne.s32.totalorder %s64_s19, %s394_s20  ;;  %p400_p8 = scmp.lt.s32.totalorder %s394_s20, %s394_s20 }
  0x30   :  { %p401_p9 = por %p400_p8, %p399_p7 }
  0x32   :  { %p402_p10 = pnand %p401_p9, %p395_p6 }
  0x34   :  { %405 = shalt.err (!%p402_p10)
}
  0x35   :  { %s440_s21 = smov [#allocation11]  }
  0x36   :  { %66 = dma.vmem_to_smem %s64_s19, 16, %s440_s21, [#allocation10]  }
  0x37   :  { %428 = dma.done.wait [#allocation5], 64  }
  0x38   :  { %429 = vsyncadd [#allocation5], 4294967232 }
  0x39   :  { %430 = dma.done.wait [#allocation7], 80  }
  0x3a   :  { %431 = vsyncadd [#allocation7], 4294967216 }
  0x3b   :  { %432 = dma.done.wait [#allocation10], 32  }
  0x3c   :  { %433 = vsyncadd [#allocation10], 4294967264 }
  0x3d   :  { %86 = sfence }
  0x3e   :  { %s89_s22 = sld [smem:[#allocation3]]  ;;  %s277_s23 = sld [smem:[#allocation3 + $0x1]]  ;;  %v87_v0 = vld [vmem:[%s593_s6] sm:$0x1]  ;;  %v88_v1 = vld [vmem:[%s593_s6 + $0x1] sm:$0x1] }
  0x3f   :  { %s497_s4 = sld [smem:[#allocation6]]  ;;  %s279_s25 = sld [smem:[#allocation3 + $0x81]] }
  0x40   :  { %s278_s24 = sld [smem:[#allocation3 + $0x80]]  ;;  %s499_s26 = sld [smem:[#allocation6 + $0x1]] }
  0x41   :  { %s281_s27 = sld [smem:[#allocation3 + $0x100]]  ;;  %s282_s30 = sld [smem:[#allocation3 + $0x101]] }
  0x42   :  { %s504_s8 = sld [smem:[#allocation6 + $0x2]]  ;;  %s284_s3 = sld [smem:[#allocation3 + $0x180]] }
  0x43   :  { %s285_s10 = sld [smem:[#allocation3 + $0x181]]  ;;  %s286_s11 = sld [smem:[#allocation6 + $0x3]] }
  0x44   :  { %v90_v2 = vstv %s89_s22  ;;  %v93_v4 = vstv %s277_s23  ;;  %s512_s6 = sld [smem:[#allocation8]]  ;;  %s514_s12 = sld [smem:[#allocation8 + $0x1]] }
  0x45   :  { %v91_v3 = vmul.f32 %v90_v2, %v87_v0  ;;  %v94_v5 = vmul.f32 %v93_v4, %v88_v1  ;;  %v108_v7 = vstv %s279_s25  ;;  %v97_v8 = vstv %s497_s4  ;;  %s516_s13 = sld [smem:[#allocation8 + $0x2]]  ;;  %s518_s14 = sld [smem:[#allocation8 + $0x3]] }
  0x46   :  { %v105_v6 = vstv %s278_s24  ;;  %v109_v10 = vmul.f32 %v108_v7, %v88_v1  ;;  %v112_v13 = vstv %s499_s26  ;;  %s520_s15 = sld [smem:[#allocation8 + $0x80]]  ;;  %s522_s16 = sld [smem:[#allocation8 + $0x81]] }
  0x47   :  { %v106_v9 = vmul.f32 %v105_v6, %v87_v0  ;;  %v120_v11 = vstv %s281_s27  ;;  %v95_v12 = vadd.f32 %v94_v5, %v91_v3  ;;  %v123_v15 = vstv %s282_s30  ;;  %s524_s17 = sld [smem:[#allocation8 + $0x82]]  ;;  %s526_s0 = sld [smem:[#allocation8 + $0x100]] }
  0x48   :  { %v121_v14 = vmul.f32 %v120_v11, %v87_v0  ;;  %v124_v17 = vmul.f32 %v123_v15, %v88_v1  ;;  %v135_v18 = vstv %s284_s3  ;;  %v127_v21 = vstv %s504_s8  ;;  %s528_s2 = sld [smem:[#allocation8 + $0x180]]  ;;  %s530_s18 = sld [smem:[#allocation8 + $0x101]] }
  0x49   :  { %v110_v16 = vadd.f32 %v109_v10, %v106_v9  ;;  %v138_v19 = vstv %s285_s10  ;;  %v98_v20 = vadd.f32 %v97_v8, %v95_v12  ;;  %v136_v22 = vmul.f32 %v135_v18, %v87_v0  ;;  %s532_s19 = sld [smem:[#allocation8 + $0x181]]  ;;  %s534_s20 = sld [smem:[#allocation8 + $0x83]] }
  0x4a   :  { %v139_v23 = vmul.f32 %v138_v19, %v88_v1  ;;  %v125_v25 = vadd.f32 %v124_v17, %v121_v14  ;;  %v142_v26 = vstv %s286_s11  ;;  %s536_s21 = sld [smem:[#allocation8 + $0x102]]  ;;  %s538_s22 = sld [smem:[#allocation9]]  ;;  %v150_v46 = vstv %s512_s6 }
  0x4b   :  { %v113_v24 = vadd.f32 %v112_v13, %v110_v16  ;;  %v99_v27 = vsub.f32 0.0, %v98_v20  ;;  %s540_s23 = sld [smem:[#allocation8 + $0x103]]  ;;  %s542_s4 = sld [smem:[#allocation8 + $0x182]]  ;;  %v153_v47 = vstv %s514_s12  ;;  %v157_v51 = vstv %s516_s13 }
  0x4c   :  { %v140_v28 = vadd.f32 %v139_v23, %v136_v22  ;;  %v128_v30 = vadd.f32 %v127_v21, %v125_v25  ;;  %s544_s24 = sld [smem:[#allocation8 + $0x183]]  ;;  %v173_v48 = vstv %s520_s15  ;;  %v176_v52 = vstv %s522_s16  ;;  %s553_s25 = sld [smem:[#allocation9 + $0x1]] }
  0x4d   :  { %v114_v29 = vsub.f32 0.0, %v113_v24  ;;  %v100_v31 = vmul.f32 1.442695, %v99_v27  ;;  %v196_v49 = vstv %s526_s0  ;;  %v161_v56 = vstv %s518_s14  ;;  %s561_s26 = sld [smem:[#allocation9 + $0x2]]  ;;  %s563_s27 = sld [smem:[#allocation9 + $0x3]] }
  0x4e   :  { %v143_v32 = vadd.f32 %v142_v26, %v140_v28  ;;  %v129_v34 = vsub.f32 0.0, %v128_v30  ;;  %v219_v50 = vstv %s528_s2  ;;  %v199_v53 = vstv %s530_s18  ;;  %s241_s28 = sld [smem:[#allocation11]]  ;;  %s305_s29 = sld [smem:[#allocation11 + $0x1]] }
  0x4f   :  { %v115_v33 = vmul.f32 1.442695, %v114_v29  ;;  %314 = vpow2.f32 %v100_v31  ;;  %v222_v54 = vstv %s532_s19  ;;  %v180_v57 = vstv %s524_s17  ;;  %s306_s30 = sld [smem:[#allocation11 + $0x2]]  ;;  %s307_s8 = sld [smem:[#allocation11 + $0x3]] }
  0x50   :  { %v144_v35 = vsub.f32 0.0, %v143_v32  ;;  %v130_v36 = vmul.f32 1.442695, %v129_v34  ;;  %v184_v58 = vstv %s534_s20  ;;  %v203_v59 = vstv %s536_s21  ;;  %s441_s3 = smov [#allocation12]  }
  0x51   :  { %316 = vpow2.f32 %v115_v33  ;;  %v165_v6 = vstv %s538_s22  ;;  %v207_v7 = vstv %s540_s23  ;;  %v226_v8 = vstv %s542_s4  ;;  %s266_s10 = sshll.u32 %s441_s3, 4  ;;  %s267_s10 = int_to_ptr.vmem [resolvable:$true] %s266_s10 }
  0x52   :  { %v145_v37 = vmul.f32 1.442695, %v144_v35  ;;  %318 = vpow2.f32 %v130_v36  ;;  %v230_v9 = vstv %s544_s24  ;;  %v188_v23 = vstv %s553_s25  ;;  %s406_s11 = scalar_lea.vmem %s267_s10, 16  ;;  %s410_s6 = scalar_lea.vmem %s267_s10, 32 }
  0x53   :  { %v211_v29 = vstv %s561_s26  ;;  %v234_v34 = vstv %s563_s27  ;;  %p407_p11 = scmp.ne.s32.totalorder %s267_s10, %s406_s11  ;;  %p411_p12 = scmp.lt.s32.totalorder %s267_s10, %s267_s10 }
  0x54   :  { %320 = vpow2.f32 %v145_v37  ;;  %p412_p13 = scmp.lt.s32.totalorder %s410_s6, %s406_s11 }
  0x56   :  { %p413_p0 = por %p412_p13, %p411_p12 }
  0x58   :  { %p414_p1 = pnand %p413_p0, %p407_p11 }
  0x59   :  { %v315_v38 = vpop.eup %314 }
  0x5a   :  { %v102_v40 = vadd.f32 1.0, %v315_v38 }
  0x5b   :  { %v317_v39 = vpop.eup %316 }
  0x5c   :  { %v117_v41 = vadd.f32 1.0, %v317_v39  ;;  %v319_v42 = vpop.eup %318  ;;  %322 = vrcp.f32 %v102_v40 }
  0x5d   :  { %v132_v44 = vadd.f32 1.0, %v319_v42 }
  0x5e   :  { %v321_v43 = vpop.eup %320  ;;  %324 = vrcp.f32 %v117_v41 }
  0x5f   :  { %v147_v45 = vadd.f32 1.0, %v321_v43  ;;  %326 = vrcp.f32 %v132_v44 }
  0x61   :  { %328 = vrcp.f32 %v147_v45 }
  0x66   :  { %v323_v55 = vpop.eup %322 }
  0x67   :  { %v151_v61 = vmul.f32 %v323_v55, %v150_v46  ;;  %v174_v62 = vmul.f32 %v323_v55, %v173_v48  ;;  %v197_v63 = vmul.f32 %v323_v55, %v196_v49  ;;  %v220_v0 = vmul.f32 %v323_v55, %v219_v50 }
  0x68   :  { %v325_v60 = vpop.eup %324  ;;  %v245_v55 = vstv %s305_s29 }
  0x69   :  { %v154_v1 = vmul.f32 %v325_v60, %v153_v47  ;;  %v177_v2 = vmul.f32 %v325_v60, %v176_v52  ;;  %v200_v3 = vmul.f32 %v325_v60, %v199_v53  ;;  %v223_v4 = vmul.f32 %v325_v60, %v222_v54  ;;  %v327_v5 = vpop.eup %326 }
  0x6a   :  { %v158_v12 = vmul.f32 %v327_v5, %v157_v51  ;;  %v181_v14 = vmul.f32 %v327_v5, %v180_v57  ;;  %v204_v18 = vmul.f32 %v327_v5, %v203_v59  ;;  %v227_v25 = vmul.f32 %v327_v5, %v226_v8 }
  0x6b   :  { %v329_v10 = vpop.eup %328  ;;  %v155_v11 = vadd.f32 %v154_v1, %v151_v61  ;;  %v178_v13 = vadd.f32 %v177_v2, %v174_v62  ;;  %v201_v17 = vadd.f32 %v200_v3, %v197_v63  ;;  %v224_v22 = vadd.f32 %v223_v4, %v220_v0 }
  0x6c   :  { %v162_v15 = vmul.f32 %v329_v10, %v161_v56  ;;  %v185_v16 = vmul.f32 %v329_v10, %v184_v58  ;;  %v208_v21 = vmul.f32 %v329_v10, %v207_v7  ;;  %v231_v26 = vmul.f32 %v329_v10, %v230_v9 }
  0x6d   :  { %v159_v19 = vadd.f32 %v158_v12, %v155_v11  ;;  %v182_v20 = vadd.f32 %v181_v14, %v178_v13  ;;  %v205_v24 = vadd.f32 %v204_v18, %v201_v17  ;;  %v228_v31 = vadd.f32 %v227_v25, %v224_v22 }
  0x6e   :  { %v242_v54 = vstv %s241_s28  ;;  %v249_v57 = vstv %s306_s30  ;;  %v253_v60 = vstv %s307_s8  ;;  %v257_v4 = vstv %s592_s5 }
  0x6f   :  { %v163_v27 = vadd.f32 %v162_v15, %v159_v19  ;;  %v186_v28 = vadd.f32 %v185_v16, %v182_v20  ;;  %v209_v30 = vadd.f32 %v208_v21, %v205_v24  ;;  %v232_v36 = vadd.f32 %v231_v26, %v228_v31 }
  0x71   :  { %v166_v32 = vadd.f32 %v165_v6, %v163_v27  ;;  %v189_v33 = vadd.f32 %v188_v23, %v186_v28  ;;  %v212_v35 = vadd.f32 %v211_v29, %v209_v30  ;;  %v235_v40 = vadd.f32 %v234_v34, %v232_v36 }
  0x73   :  { %v167_v37 = vsub.f32 0.0, %v166_v32  ;;  %v190_v38 = vsub.f32 0.0, %v189_v33  ;;  %v213_v39 = vsub.f32 0.0, %v212_v35  ;;  %v236_v44 = vsub.f32 0.0, %v235_v40 }
  0x75   :  { %v168_v41 = vmul.f32 1.442695, %v167_v37  ;;  %v191_v42 = vmul.f32 1.442695, %v190_v38  ;;  %v214_v43 = vmul.f32 1.442695, %v213_v39 }
  0x76   :  { %v237_v45 = vmul.f32 1.442695, %v236_v44 }
  0x77   :  { %330 = vpow2.f32 %v168_v41 }
  0x78   :  { %332 = vpow2.f32 %v191_v42 }
  0x79   :  { %334 = vpow2.f32 %v214_v43 }
  0x7a   :  { %336 = vpow2.f32 %v237_v45 }
  0x81   :  { %v331_v46 = vpop.eup %330 }
  0x82   :  { %v333_v47 = vpop.eup %332  ;;  %v170_v48 = vadd.f32 1.0, %v331_v46 }
  0x83   :  { %v335_v49 = vpop.eup %334  ;;  %v193_v50 = vadd.f32 1.0, %v333_v47 }
  0x84   :  { %v337_v51 = vpop.eup %336  ;;  %338 = vrcp.f32 %v170_v48  ;;  %v216_v52 = vadd.f32 1.0, %v335_v49 }
  0x85   :  { %340 = vrcp.f32 %v193_v50  ;;  %v239_v53 = vadd.f32 1.0, %v337_v51 }
  0x86   :  { %342 = vrcp.f32 %v216_v52 }
  0x87   :  { %344 = vrcp.f32 %v239_v53 }
  0x8e   :  { %v339_v56 = vpop.eup %338 }
  0x8f   :  { %v341_v58 = vpop.eup %340  ;;  %v243_v59 = vmul.f32 %v339_v56, %v242_v54 }
  0x90   :  { %v343_v61 = vpop.eup %342  ;;  %v246_v62 = vmul.f32 %v341_v58, %v245_v55 }
  0x91   :  { %v345_v63 = vpop.eup %344  ;;  %v250_v0 = vmul.f32 %v343_v61, %v249_v57 }
  0x92   :  { %v247_v1 = vadd.f32 %v246_v62, %v243_v59  ;;  %v254_v2 = vmul.f32 %v345_v63, %v253_v60 }
  0x94   :  { %v251_v3 = vadd.f32 %v250_v0, %v247_v1 }
  0x96   :  { %v255_v5 = vadd.f32 %v254_v2, %v251_v3 }
  0x98   :  { %v258_v6 = vadd.f32 %v257_v4, %v255_v5 }
  0x9a   :  { %259 = vst [vmem:[#allocation12] sm:$0x1] %v258_v6 }
  0x9b   :  { %417 = shalt.err (!%p414_p1)
}
  0x9c   :  { %s418_s14 = scalar_lea.hbm %s594_s7, 16 }
  0x9d   :  { %p419_p2 = scmp.ne.s32.totalorder %s594_s7, %s418_s14  ;;  %p422_p3 = scmp.lt.u32.totalorder %s418_s14, %s594_s7 }
  0x9f   :  { %p424_p4 = pnand %p422_p3, %p419_p2 }
  0xa1   :  { %427 = shalt.err (!%p424_p4)
}
  0xa2   :  { %269 = dma.vmem_to_hbm [thread:$0]  %s267_s10, 16, %s594_s7, [#allocation4]  }
  0xa3   :  { %434 = dma.done.wait [#allocation4], 16  }
  0xa4   :  { %435 = vsyncadd [#allocation4], 4294967280 }
  0xa5   :  { %273 = vsyncpa [#allocation4], 1 }
  0xa6   :  { %274 = vsyncpa [#allocation5], 1 }
  0xa7   :  { %275 = vsyncpa [#allocation7], 1 }
  0xa8   :  { %276 = vsyncpa [#allocation10], 1 }

</bundles_post_ra>
